<compile_context>
chip_gen: v7x
topology: tpu7x:2x2x1
jax: 0.10.0
libtpu: 0.0.40
codegen_flags: <defaults>
</compile_context>

<pallas_src>
import jax
import jax.numpy as jnp
from jax.experimental import pallas as pl
from jax.experimental.pallas import tpu as pltpu


def vq_kernel(xT_ref, w_ref, wT_ref, w2h_ref, qT_ref, idx_ref):
    # xT_ref : (D, TM)  input vectors, token axis on lanes
    # w_ref  : (K, D)   codebook
    # wT_ref : (D, K)   codebook pre-transposed in the wrapper (no in-kernel transpose)
    # w2h_ref: (K, 1)   0.5 * ||w_k||^2 precomputed in the wrapper
    # qT_ref : (D, TM)  quantized vectors (transposed, lane-dense in tokens)
    # idx_ref: (1, TM)  codebook indices (lane-dense)
    xT = xT_ref[...]
    w = w_ref[...]
    wT = wT_ref[...]
    w2h = w2h_ref[...]

    # d_k(x) = 0.5*||w_k||^2 - x.w_k  (monotone transform of ||x - w_k||^2)
    xw = jnp.dot(w, xT, preferred_element_type=jnp.float32)   # (K, TM) on the MXU
    d = w2h - xw                                              # (K, TM)

    K = d.shape[0]
    kio = jax.lax.broadcasted_iota(jnp.int32, d.shape, 0)     # (K, TM) row indices

    # First-minimum index along K (matches torch.argmin tie-breaking).
    dmin = jnp.min(d, axis=0, keepdims=True)                  # (1, TM)
    idx = jnp.min(jnp.where(d == dmin, kio, K),
                  axis=0, keepdims=True)                      # (1, TM) int32
    idx_ref[...] = idx

    # Gather codebook rows as a one-hot matmul (exact in f32), output kept transposed
    # so the store is lane-dense in the token axis.
    onehot = (kio == idx).astype(jnp.float32)                 # (K, TM)
    qT_ref[...] = jnp.dot(wT, onehot,
                          preferred_element_type=jnp.float32).astype(qT_ref.dtype)


def vector_quantize(x, weight, *, tm=128):
    """x: (B, N, D) or (B, N, D, 1) float32; weight: (K, D) float32.

    Returns (quantized (B, N, D), indices (B, N) int32).
    tm must be a multiple of 128; raise it (up to VMEM) for large B*N.
    """
    if x.ndim == 4 and x.shape[-1] == 1:
        x = jnp.squeeze(x, -1)          # torch's x.squeeze(-1)
    B, N, D = x.shape
    K, Dw = weight.shape
    assert D == Dw
    assert tm % 128 == 0

    M = B * N
    G = pl.cdiv(M, tm)                  # >= 2 for the shipped (2, 96, 11) shape
    Mpad = G * tm

    # Layout plumbing in the wrapper (outside the kernel):
    #   - pad token count to a multiple of tm, transpose so tokens are the lane axis
    #   - hoist 0.5*||W||^2 and W^T out of the kernel
    xT = jnp.pad(x.reshape(M, D), ((0, Mpad - M), (0, 0))).T       # (D, Mpad)
    wT = weight.T                                                  # (D, K)
    w2h = 0.5 * jnp.sum(weight * weight, axis=-1, keepdims=True)   # (K, 1)

    qT, idx = pl.pallas_call(
        vq_kernel,
        out_shape=(
            jax.ShapeDtypeStruct((D, Mpad), x.dtype),
            jax.ShapeDtypeStruct((1, Mpad), jnp.int32),
        ),
        grid_spec=pltpu.PrefetchScalarGridSpec(
            num_scalar_prefetch=0,
            grid=(G,),
            in_specs=[
                pl.BlockSpec((D, tm), lambda i: (0, i)),   # token tile (lane-dense)
                pl.BlockSpec((K, D), lambda i: (0, 0)),    # codebook (tiny, resident)
                pl.BlockSpec((D, K), lambda i: (0, 0)),    # codebook^T
                pl.BlockSpec((K, 1), lambda i: (0, 0)),    # 0.5*||w||^2
            ],
            out_specs=(
                pl.BlockSpec((D, tm), lambda i: (0, i)),   # quantized^T, lane-dense
                pl.BlockSpec((1, tm), lambda i: (0, i)),   # indices, lane-dense
            ),
        ),
        compiler_params=pltpu.CompilerParams(
            dimension_semantics=("parallel",),             # feeds both TCs on v7x
            vmem_limit_bytes=32 * 1024 * 1024,             # headroom if tm is raised
        ),
    )(xT, weight, wT, w2h)

    quantized = qT.T[:M].reshape(B, N, D)
    indices = idx[0, :M].reshape(B, N)
    return quantized, indices


def reference(x, weight):
    # Pure-JAX reference matching torch.cdist + argmin + embedding lookup.
    if x.ndim == 4 and x.shape[-1] == 1:
        x = jnp.squeeze(x, -1)
    d = jnp.linalg.norm(x[:, :, None, :] - weight[None, None, :, :], axis=-1)
    idx = jnp.argmin(d, axis=-1)
    return weight[idx], idx


if __name__ == "__main__":
    # VQVAE hyperparameters: embedding_dim=11, num_embeddings (embedding_size)=16, beta=0.2.
    embedding_dim = 11
    num_embeddings = 16
    beta = 0.2  # used only by loss(), not by forward

    key = jax.random.PRNGKey(0)
    kx, kw = jax.random.split(key)

    # The quantizer sees the encoder output: (batch, hidden_channels=96, embedding_dim=11).
    B, N = 2, 96
    x = jax.random.normal(kx, (B, N, embedding_dim), dtype=jnp.float32)
    # torch.nn.Embedding default init: N(0, 1)
    weight = jax.random.normal(kw, (num_embeddings, embedding_dim), dtype=jnp.float32)

    quantized, indices = vector_quantize(x, weight)
    jax.block_until_ready((quantized, indices))

    q_ref, idx_ref = reference(x, weight)
    assert quantized.shape == (B, N, embedding_dim) and indices.shape == (B, N)
    assert bool(jnp.all(indices == idx_ref))
    assert bool(jnp.allclose(quantized, q_ref, atol=1e-5))

    print("KERNEL_OK")
</pallas_src>

<mosaic_0001>
module attributes {stable_mosaic.version = 11 : i64} {
  func.func @vq_kernel(%arg0: i32, %arg1: memref<11x128xf32, #tpu.memory_space<vmem>>, %arg2: memref<16x11xf32, #tpu.memory_space<vmem>>, %arg3: memref<11x16xf32, #tpu.memory_space<vmem>>, %arg4: memref<16x1xf32, #tpu.memory_space<vmem>>, %arg5: memref<11x128xf32, #tpu.memory_space<vmem>>, %arg6: memref<1x128xi32, #tpu.memory_space<vmem>>) attributes {dimension_semantics = [#tpu.dimension_semantics<parallel>], iteration_bounds = array<i64: 2>, scalar_prefetch = 0 : i64, scratch_operands = 0 : i64, tpu.core_type = #tpu.core_type<tc>, window_params = [{transform_indices = @transform_0, window_bounds = array<i64: 11, 128>}, {pipeline_mode = #tpu.pipeline_mode<synchronous>, transform_indices = @transform_1, window_bounds = array<i64: 16, 11>}, {pipeline_mode = #tpu.pipeline_mode<synchronous>, transform_indices = @transform_2, window_bounds = array<i64: 11, 16>}, {pipeline_mode = #tpu.pipeline_mode<synchronous>, transform_indices = @transform_3, window_bounds = array<i64: 16, 1>}, {transform_indices = @transform_4, window_bounds = array<i64: 11, 128>}, {transform_indices = @transform_5, window_bounds = array<i64: 1, 128>}]} {
    %c0 = arith.constant 0 : index
    %c0_0 = arith.constant 0 : index
    %0 = vector.load %arg1[%c0, %c0_0] : memref<11x128xf32, #tpu.memory_space<vmem>>, vector<11x128xf32>
    %c0_1 = arith.constant 0 : index
    %c0_2 = arith.constant 0 : index
    %1 = vector.load %arg2[%c0_1, %c0_2] : memref<16x11xf32, #tpu.memory_space<vmem>>, vector<16x11xf32>
    %c0_3 = arith.constant 0 : index
    %c0_4 = arith.constant 0 : index
    %2 = vector.load %arg3[%c0_3, %c0_4] : memref<11x16xf32, #tpu.memory_space<vmem>>, vector<11x16xf32>
    %c0_5 = arith.constant 0 : index
    %c0_6 = arith.constant 0 : index
    %3 = vector.load %arg4[%c0_5, %c0_6] : memref<16x1xf32, #tpu.memory_space<vmem>>, vector<16x1xf32>
    %cst = arith.constant dense<0.000000e+00> : vector<16x128xf32>
    %4 = tpu.matmul %1, %0, %cst {dimension_numbers = #tpu.dot_dimension_numbers<[1], [0], [0], [1], [0, 0, 1, 1], [], []>} : vector<16x11xf32>, vector<11x128xf32>, vector<16x128xf32> -> vector<16x128xf32>
    %5 = vector.broadcast %3 : vector<16x1xf32> to vector<16x128xf32>
    %6 = arith.subf %5, %4 : vector<16x128xf32>
    %7 = tpu.iota {dimensions = array<i32: 0>} : vector<16x128xi32>
    %cst_7 = arith.constant dense<0x7F800000> : vector<128xf32>
    %8 = vector.multi_reduction <minimumf>, %6, %cst_7 [0] : vector<16x128xf32> to vector<128xf32>
    %9 = vector.shape_cast %8 : vector<128xf32> to vector<1x128xf32>
    %10 = vector.broadcast %9 : vector<1x128xf32> to vector<16x128xf32>
    %11 = arith.cmpf oeq, %6, %10 : vector<16x128xf32>
    %c16_i32 = arith.constant 16 : i32
    %12 = vector.broadcast %c16_i32 : i32 to vector<16x128xi32>
    %13 = arith.select %11, %7, %12 : vector<16x128xi1>, vector<16x128xi32>
    %cst_8 = arith.constant dense<2147483647> : vector<128xi32>
    %14 = vector.multi_reduction <minsi>, %13, %cst_8 [0] : vector<16x128xi32> to vector<128xi32>
    %15 = vector.shape_cast %14 : vector<128xi32> to vector<1x128xi32>
    %c0_9 = arith.constant 0 : index
    %c0_10 = arith.constant 0 : index
    %16 = vector.load %arg6[%c0_9, %c0_10] : memref<1x128xi32, #tpu.memory_space<vmem>>, vector<1x128xi32>
    tpu.vector_store %arg6[%c0_9, %c0_10], %15 {strides = array<i32>} : memref<1x128xi32, #tpu.memory_space<vmem>>, vector<1x128xi32>,
    %17 = vector.broadcast %15 : vector<1x128xi32> to vector<16x128xi32>
    %18 = arith.cmpi eq, %7, %17 : vector<16x128xi32>
    %19 = arith.extui %18 : vector<16x128xi1> to vector<16x128xi32>
    %20 = arith.sitofp %19 : vector<16x128xi32> to vector<16x128xf32>
    %cst_11 = arith.constant dense<0.000000e+00> : vector<11x128xf32>
    %21 = tpu.matmul %2, %20, %cst_11 {dimension_numbers = #tpu.dot_dimension_numbers<[1], [0], [0], [1], [0, 0, 1, 1], [], []>} : vector<11x16xf32>, vector<16x128xf32>, vector<11x128xf32> -> vector<11x128xf32>
    %c0_12 = arith.constant 0 : index
    %c0_13 = arith.constant 0 : index
    %22 = vector.load %arg5[%c0_12, %c0_13] : memref<11x128xf32, #tpu.memory_space<vmem>>, vector<11x128xf32>
    tpu.vector_store %arg5[%c0_12, %c0_13], %21 {strides = array<i32>} : memref<11x128xf32, #tpu.memory_space<vmem>>, vector<11x128xf32>,
    return
  }
  func.func @transform_0(%arg0: i32) -> (i32, i32) {
    %c0_i32 = arith.constant 0 : i32
    %c0_i32_0 = arith.constant 0 : i32
    return %c0_i32, %arg0 : i32, i32
  }
  func.func @transform_1(%arg0: i32) -> (i32, i32) {
    %c0_i32 = arith.constant 0 : i32
    %c0_i32_0 = arith.constant 0 : i32
    %c0_i32_1 = arith.constant 0 : i32
    return %c0_i32, %c0_i32_0 : i32, i32
  }
  func.func @transform_2(%arg0: i32) -> (i32, i32) {
    %c0_i32 = arith.constant 0 : i32
    %c0_i32_0 = arith.constant 0 : i32
    %c0_i32_1 = arith.constant 0 : i32
    return %c0_i32, %c0_i32_0 : i32, i32
  }
  func.func @transform_3(%arg0: i32) -> (i32, i32) {
    %c0_i32 = arith.constant 0 : i32
    %c0_i32_0 = arith.constant 0 : i32
    %c0_i32_1 = arith.constant 0 : i32
    return %c0_i32, %c0_i32_0 : i32, i32
  }
  func.func @transform_4(%arg0: i32) -> (i32, i32) {
    %c0_i32 = arith.constant 0 : i32
    %c0_i32_0 = arith.constant 0 : i32
    return %c0_i32, %arg0 : i32, i32
  }
  func.func @transform_5(%arg0: i32) -> (i32, i32) {
    %c0_i32 = arith.constant 0 : i32
    %c0_i32_0 = arith.constant 0 : i32
    return %c0_i32, %arg0 : i32, i32
  }
}

</mosaic_0001>

<bundles_post_ra>
// kernel: tpu_custom_call.1
= control target key start
LH: loop header
LB: loop body
LE: loop exit
PB: predicated region body
PF: predicated region fallthrough
CT: control target
= control target key end

     0   :  { %11 = vsyncpa [#allocation3], 0  ;;  %s1211_s0 = inlined_call_operand.hbm [shape: f32[11,256], index: 0, kind: input, shape index: {}]   ;;  %s1212_s1 = inlined_call_operand.vmem [shape: f32[16,11], index: 1, kind: input, shape index: {}]   ;;  %s1213_s2 = inlined_call_operand.hbm [shape: f32[11,16], index: 2, kind: input, shape index: {}]   ;;  %s1214_s3 = inlined_call_operand.vmem [shape: f32[16,1], index: 3, kind: input, shape index: {}]   ;;  %s1215_s4 = inlined_call_operand.hbm [shape: f32[11,256], index: 4, kind: output, shape index: {0}]   ;;  %s1216_s5 = inlined_call_operand.hbm [shape: s32[1,256], index: 5, kind: output, shape index: {1}]  }
   0x1   :  { %13 = vsyncpa [#allocation3 + $0x1], 0 }
   0x2   :  { %14 = vsyncpa [#allocation6], 0 }
   0x3   :  { %15 = vsyncpa [#allocation4], 0 }
   0x4   :  { %17 = vsyncpa [#allocation4 + $0x1], 0 }
   0x5   :  { %18 = vsyncpa [#allocation9], 0 }
   0x6   :  { %20 = vsyncpa [#allocation9 + $0x1], 0  ;;  %s963_s18 = smov 0   ;;  %s965_s19 = smov 0  }
   0x7   :  { %s967_s20 = smov 0   ;;  %s969_s21 = smov 0  }
   0x8 LB: > { %s984_s22 = sadd.s32 4294967295, %s918_s21   ;;  %s630_s23 = sadd.s32 4294967294, %s918_s21   ;;  %s918_s21 = sphi %s969_s21, %s1242_s21   ;;  %s914_s20 = sphi %s967_s20, %s1241_s20   ;;  %s910_s19 = sphi %s965_s19, %s1240_s19   ;;  %s906_s18 = sphi %s963_s18, %s1239_s18  }
   0x9   : > { %s988_s24 = sadd.s32 1, %s918_s21   ;;  %s33_s25 = sadd.s32 1, %s914_s20 }
   0xa   : > { %s30_s26 = ssub.s32 %s918_s21, %s988_s24  ;;  %p40_p0 = scmp.ne.s32.totalorder %s914_s20, %s910_s19 }
   0xb   : > { %p31_p1 = scmp.eq.s32.totalorder %s30_s26, 0  ;;  %p41_p2 = scmp.eq.s32.totalorder %s918_s21, 0 }
   0xc   : > { %p46_p3 = scmp.ne.s32.totalorder %s910_s19, %s906_s18  ;;  %p1217_p4 = scmp.eq.s32.totalorder %s984_s22, 0 }
   0xd   : > { %s1000_s27 = scalar_select %p31_p1, %s914_s20, %s33_s25  }
   0xe   : > { %p1002_p5 = por %p41_p2, %p40_p0  ;;  %p1008_p6 = por %p1217_p4, %p46_p3 }
   0xf   : > { %p133_p7 = scmp.eq.s32.totalorder %s984_s22, 1  ;;  %p139_p8 = scmp.eq.s32.totalorder %s630_s23, 1 }
  0x10   : > { %s1222_s28 = scalar_select %p1002_p5, 1, 0 }
  0x11   : > { %s1223_s29 = scalar_select %p1008_p6, 1, 0 }
  0x12   : > { %p631_p9 = scmp.ge.s32.totalorder %s918_s21, 1  ;;  %p172_p10 = scmp.lt.s32.totalorder %s918_s21, 3 }
  0x13   : > { %p1015_p11 = por %p133_p7, %p40_p0  ;;  %p1019_p12 = por %p139_p8, %p46_p3 }
  0x14   : > { %p1023_p13 = pnand %p631_p9, %p172_p10  ;;  %s920_s8 = smov [#allocation5]  }
  0x15   : > { %s1224_s30 = scalar_select %p1015_p11, 1, 0 }
  0x16   : > { %s1225_s6 = scalar_select %p1019_p12, 1, 0 }
  0x17   : > { %s1226_s7 = scalar_select %p1023_p13, 1, 0 }
  0x18   : > { %p696_p1 = pneg %p1023_p13  ;;  %s187_s9 = sshll.u32 %s920_s8, 4  ;;  %s188_s9 = int_to_ptr.vmem [resolvable:$true] %s187_s9 }
  0x19   : > { %s204_s11 = sand.u32 1, %s914_s20   ;;  %s758_s14 = scalar_lea.hbm %s1213_s2, 256 }
  0x1a   : > { %p1031_p2 = pnand %p696_p1, %p1217_p4  ;;  %p759_p7 = scmp.ne.s32.totalorder %s1213_s2, %s758_s14 }
  0x1b   : > { %p765_p1 = scmp.lt.u32.totalorder %s758_s14, %s1213_s2 }
  0x1c   : > { %p760_p8 = pneg %p1031_p2 }
  0x1e   : > { %p761_p9 = pnand %p760_p8, %p759_p7 }
  0x20   : > { %p762_p10 = pneg %p761_p9 }
  0x22   : > { %p767_p4 = pnand %p765_p1, %p762_p10 }
  0x24   : > { %770 = shalt.err (!%p767_p4)
}
  0x25   : > { %s771_s25 = scalar_lea.vmem %s188_s9, 256  ;;  %p779_p11 = scmp.lt.s32.totalorder %s188_s9, %s188_s9 }
  0x26   : > { %p772_p0 = scmp.ne.s32.totalorder %s188_s9, %s771_s25  ;;  %p780_p6 = scmp.lt.s32.totalorder %s771_s25, %s771_s25 }
  0x28   : > { %p774_p3 = pnand %p772_p0, %p760_p8  ;;  %p781_p13 = por %p780_p6, %p779_p11 }
  0x2a   : > { %p775_p12 = pneg %p774_p3 }
  0x2c   : > { %p782_p5 = pnand %p781_p13, %p775_p12 }
  0x2e   : > { %785 = shalt.err (!%p782_p5)
}
  0x2f   : > { %s1221_s26 = smov 128   ;;  %s922_s8 = smov 8  }
  0x30   : > { %699 = dma.hbm_to_vmem [thread:$0]  (!%p1031_p2), %s1213_s2, 256, %s188_s9, [#allocation6], %s1221_s26, %s1221_s26, %s922_s8  }
  0x31   : > { %p1228_p4 = scmp.ne.s32.totalorder %s1222_s28, 0  ;;  %p1229_p0 = scmp.lt.s32.totalorder %s918_s21, 2 }
  0x32   : > { %s634_s15 = sshll.u32 %s204_s11, 4  ;;  %s635_s16 = sshll.u32 %s918_s21, 7 }
  0x33   : > { %p1061_p3 = pnand %p1229_p0, %p1228_p4  ;;  %s1069_s10 = scalar_lea.hbm %s1211_s0, %s635_s16 }
  0x34   : > { %s208_s9 = scalar_lea.vmem [#allocation2], %s634_s15  ;;  %s1073_s25 = scalar_lea.sflag [#allocation3], %s204_s11 }
  0x35   : > { %s214_s28 = sshll.u32 %s208_s9, 4  ;;  %s786_s12 = scalar_lea.hbm %s1069_s10, 256  ;;  %s1071_s28 = int_to_ptr.vmem [resolvable:$true] %s214_s28 }
  0x36   : > { %p787_p5 = scmp.ne.s32.totalorder %s1069_s10, %s786_s12  ;;  %p788_p6 = pneg %p1061_p3 }
  0x37   : > { %s791_s17 = scalar_lea.hbm %s1211_s0, 512  ;;  %p792_p13 = scmp.lt.u32.totalorder %s1069_s10, %s1211_s0 }
  0x38   : > { %p789_p11 = pnand %p788_p6, %p787_p5  ;;  %p793_p2 = scmp.lt.u32.totalorder %s791_s17, %s786_s12 }
  0x39   : > { %p795_p8 = scmp.lt.u32.totalorder %s786_s12, %s1069_s10 }
  0x3a   : > { %p790_p12 = pneg %p789_p11  ;;  %p794_p7 = por %p793_p2, %p792_p13 }
  0x3c   : > { %p796_p9 = por %p795_p8, %p794_p7 }
  0x3e   : > { %p797_p10 = pnand %p796_p9, %p790_p12 }
  0x40   : > { %800 = shalt.err (!%p797_p10)
}
  0x41   : > { %s801_s11 = scalar_lea.vmem %s1071_s28, 256  ;;  %s923_s15 = smov [#allocation2]  }
  0x42   : > { %p802_p1 = scmp.ne.s32.totalorder %s1071_s28, %s801_s11  ;;  %s806_s9 = sshll.u32 %s923_s15, 4  ;;  %s807_s9 = int_to_ptr.vmem [resolvable:$false] %s806_s9 }
  0x43   : > { %s808_s26 = scalar_lea.vmem %s807_s9, 512  ;;  %p809_p5 = scmp.lt.s32.totalorder %s1071_s28, %s807_s9 }
  0x44   : > { %p804_p4 = pnand %p802_p1, %p788_p6  ;;  %p810_p11 = scmp.lt.s32.totalorder %s808_s26, %s801_s11 }
  0x46   : > { %p805_p0 = pneg %p804_p4  ;;  %p811_p13 = por %p810_p11, %p809_p5 }
  0x48   : > { %p812_p2 = pnand %p811_p13, %p805_p0 }
  0x4a   : > { %815 = shalt.err (!%p812_p2)
}
  0x4b   : > { %s924_s12 = smov 256   ;;  %s1231_s13 = smov 128  }
  0x4c   : > { %703 = dma.hbm_to_vmem [thread:$0]  (!%p1061_p3), %s1069_s10, 256, %s1071_s28, %s1073_s25, %s924_s12, %s1231_s13, %s922_s8  }
  0x4d   : > { %p1232_p6 = scmp.ne.s32.totalorder %s1226_s7, 0 }
  0x4e   : > { %s1106_s16 = sand.u32 (!%p1232_p6), 1, %s910_s19   ;;  %p1233_p12 = scmp.ne.s32.totalorder (!%p1232_p6), %s1223_s29, 0 }
  0x4f   : > { %226 = sbr.rel (%p1232_p6) target bundleno = 578 (0x242), region = 36  ;;  %s637_s17 = sshll.u32 (!%p1232_p6), %s1106_s16, 4 }
  0x50   : > { %s229_s23 = scalar_lea.sflag (!%p1232_p6), [#allocation3], %s1106_s16  ;;  %s232_s14 = scalar_lea.vmem (!%p1232_p6), [#allocation2], %s637_s17 }
  0x56   : > { %889 = dma.done.wait (%p1233_p12), %s229_s23, 256  }
  0x57   : > { %891 = vsyncadd (%p1233_p12), %s229_s23, 4294967040  ;;  %p1234_p3 = scmp.eq.s32.totalorder %s984_s22, 0 }
  0x59   : > { %893 = dma.done.wait (%p1234_p3), [#allocation6], 256   ;;  %p1235_p7 = pmov %p1234_p3 }
  0x5a   : > { %v925_v0 = vmov 0   ;;  %vm282_vm0 = vcmask 1042432   ;;  %vm275_vm1 = vcmask 89088   ;;  %vm926_vm2 = vmmov 1   ;;  %v267_v1 = vld [vmem:[%s232_s14] sm:$0xff]  ;;  %v274_v6 = vld [vmem:[%s1214_s3 + $0x8] sm:$0xff] }
  0x5b   : > { %895 = vsyncadd (%p1235_p7), [#allocation6], 4294967040  ;;  %757 = vset.pattern.permute.xlu0 %v925_v0  ;;  %v268_v2 = vld [vmem:[%s232_s14 + $0x8] sm:$0x7]  ;;  %v269_v3 = vld [vmem:[%s1212_s1] sm:$0xff]  ;;  %vm405_vm4 = vcmask 130048   ;;  %v373_v17 = vlaneseq }
  0x5c   : > { %vm677_vm3 = vmpackc.low %vm282_vm0, %vm926_vm2  ;;  %v676_v4 = vpack.c.bf16 %v268_v2, %v267_v1  ;;  %666 = vmatprep.mubr.msk.f32.mxu0 %vm275_vm1, %v269_v3  ;;  %v273_v5 = vld [vmem:[%s1214_s3] sm:$0xff]  ;;  %v270_v7 = vld [vmem:[%s1212_s1 + $0x8] sm:$0xff]  ;;  %s266_s9 = scalar_lea.vmem [#allocation8], %s1106_s16  ;;  %v927_v34 = vmov 1.0|1.0   ;;  %s651_s26 = sshll.u32 %s984_s22, 4 }
  0x5d   : > { %363 = vperm.xlu0 %757, %v273_v5   ;;  %v271_v8 = vld [vmem:[#allocation5] sm:$0xff]  ;;  %v374_v20 = vshrl.u32 %v373_v17, 7  ;;  %v272_v35 = vld [vmem:[#allocation5 + $0x8] sm:$0x7]  ;;  %s1139_s23 = scalar_lea.hbm %s1216_s5, %s651_s26  ;;  %s522_s14 = sshll.u32 %s266_s9, 4  ;;  %s523_s14 = int_to_ptr.vmem [resolvable:$true] %s522_s14 }
  0x5e   : > { %678 = vmatprep.subr.msk.bf16.mxu0 %vm677_vm3, %v676_v4  ;;  %673 = vmatprep.mubr.msk.f32.mxu1 %vm405_vm4, %v271_v8  ;;  %s495_s7 = scalar_lea.sflag [#allocation9], %s1106_s16  ;;  %s816_s8 = scalar_lea.vmem %s523_s14, 16 }
  0x5f   : > { %681 = vmatpush3.bf16.msk.msra.mxu0 %vm677_vm3, %v676_v4  ;;  %v375_v23 = vadd.s32 8, %v374_v20  ;;  %p817_p8 = scmp.ne.s32.totalorder %s523_s14, %s816_s8  ;;  %p1236_p9 = scmp.ne.s32.totalorder %s1224_s30, 0 }
  0x60   : > { %s928_s29 = smov [#allocation8]  }
  0x61   : > { %368 = vperm.xlu0 %757, %v274_v6   ;;  %p818_p10 = pnand %p817_p8, %p1236_p9  ;;  %s820_s10 = sshll.u32 %s928_s29, 4  ;;  %s821_s10 = int_to_ptr.vmem [resolvable:$false] %s820_s10 }
  0x62   : > { %667 = vmatmul.mubr.msk.f32.vlgmr.msra.gmra.mrb[0].mxu0 %vm275_vm1, %v270_v7  ;;  %s822_s28 = scalar_lea.vmem %s821_s10, 32  ;;  %p823_p4 = scmp.lt.s32.totalorder %s523_s14, %s821_s10 }
  0x63   : > { %p819_p1 = pneg %p818_p10  ;;  %p824_p0 = scmp.lt.s32.totalorder %s822_s28, %s816_s8 }
  0x65   : > { %p825_p5 = por %p824_p0, %p823_p4 }
  0x67   : > { %p826_p11 = pnand %p825_p5, %p819_p1 }
  0xdc   : > { %v364_v9 = vpop.permute.xlu0 %363 }
  0xe0   : > { %v369_v10 = vpop.permute.xlu0 %368 }
 0x135   : > { %v668_v11 = vpop.f32.mrb[0].mxu0 }
 0x136   : > { %v372_v12 = vsub.f32 %v369_v10, %v668_v11  ;;  %v352_v13 = vpop.f32.mrb[1].mxu0 }
 0x137   : > { %v371_v14 = vsub.f32 %v364_v9, %v352_v13 }
 0x139   : > { %v376_v15 = vmin.f32 %v371_v14, %v372_v12 }
 0x13b   : > { %v377_v16 = vrot.slane %v376_v15, 4 }
 0x13d   : > { %v378_v18 = vmin.f32 %v376_v15, %v377_v16 }
 0x13f   : > { %v379_v19 = vrot.slane %v378_v18, 2 }
 0x141   : > { %v380_v21 = vmin.f32 %v378_v18, %v379_v19 }
 0x143   : > { %v381_v22 = vrot.slane %v380_v21, 1 }
 0x145   : > { %v382_v24 = vmin.f32 %v380_v21, %v381_v22 }
 0x147   : > { %vm383_vm5 = vcmp.eq.f32.partialorder %v371_v14, %v382_v24  ;;  %vm384_vm6 = vcmp.eq.f32.partialorder %v372_v12, %v382_v24 }
 0x148   : > { %v385_v25 = vsel %vm383_vm5, %v374_v20, 16  ;;  %v386_v26 = vsel %vm384_vm6, %v375_v23, 16 }
 0x149   : > { %vm387_vm7 = vcmp.lt.s32.totalorder %v385_v25, %v386_v26 }
 0x14a   : > { %v388_v27 = vsel %vm387_vm7, %v385_v25, %v386_v26 }
 0x14b   : > { %v389_v28 = vrot.slane %v388_v27, 4 }
 0x14d   : > { %vm390_vm8 = vcmp.lt.s32.totalorder %v388_v27, %v389_v28 }
 0x14e   : > { %v391_v29 = vsel %vm390_vm8, %v388_v27, %v389_v28 }
 0x14f   : > { %v392_v30 = vrot.slane %v391_v29, 2 }
 0x151   : > { %vm393_vm9 = vcmp.lt.s32.totalorder %v391_v29, %v392_v30 }
 0x152   : > { %v394_v31 = vsel %vm393_vm9, %v391_v29, %v392_v30 }
 0x153   : > { %v395_v32 = vrot.slane %v394_v31, 1 }
 0x155   : > { %vm396_vm10 = vcmp.lt.s32.totalorder %v394_v31, %v395_v32 }
 0x156   : > { %v397_v33 = vsel %vm396_vm10, %v394_v31, %v395_v32 }
 0x157   : > { %vm399_vm11 = vcmp.eq.s32.totalorder %v374_v20, %v397_v33  ;;  %vm400_vm12 = vcmp.eq.s32.totalorder %v375_v23, %v397_v33  ;;  %398 = vst [vmem:[%s266_s9] sm:$0x1] %v397_v33 }
 0x158   : > { %vm682_vm13 = vmpackc.low %vm400_vm12, %vm399_vm11 }
 0x159   : > { %683 = vmatprep.subr.msk.bf16.mxu1 %vm682_vm13, %v927_v34 }
 0x15a   : > { %685 = vmatpush3.bf16.msk.msra.mxu1 %vm682_vm13, %v927_v34 }
 0x15d   : > { %674 = vmatmul.mubr.msk.f32.vlgmr.msra.gmra.mrb[0].mxu1 %vm405_vm4, %v272_v35 }
 0x15e   : > { %829 = shalt.err (!%p826_p11)
}
 0x15f   : > { %s830_s25 = scalar_lea.hbm %s1139_s23, 16  ;;  %s834_s9 = scalar_lea.hbm %s1216_s5, 32 }
 0x160   : > { %p831_p13 = scmp.ne.s32.totalorder %s1139_s23, %s830_s25  ;;  %p835_p12 = scmp.lt.u32.totalorder %s1139_s23, %s1216_s5 }
 0x161   : > { %p836_p3 = scmp.lt.u32.totalorder %s834_s9, %s830_s25  ;;  %p838_p8 = scmp.lt.u32.totalorder %s830_s25, %s1139_s23 }
 0x162   : > { %p832_p2 = pnand %p831_p13, %p1236_p9 }
 0x163   : > { %p837_p7 = por %p836_p3, %p835_p12 }
 0x164   : > { %p833_p6 = pneg %p832_p2 }
 0x165   : > { %p839_p10 = por %p838_p8, %p837_p7 }
 0x167   : > { %p840_p1 = pnand %p839_p10, %p833_p6 }
 0x169   : > { %843 = shalt.err (!%p840_p1)
}
 0x16a   : > { %693 = dma.vmem_to_hbm [thread:$0]  (%p1236_p9), %s523_s14, 16, %s1139_s23, %s495_s7  }
 0x16b   : > { %s260_s13 = scalar_lea.vmem [#allocation7], %s637_s17  ;;  %s650_s29 = sshll.u32 %s984_s22, 7 }
 0x16c   : > { %s506_s8 = sshll.u32 %s260_s13, 4  ;;  %s1167_s25 = scalar_lea.hbm %s1215_s4, %s650_s29  ;;  %s1162_s8 = int_to_ptr.vmem [resolvable:$true] %s506_s8 }
 0x16d   : > { %s490_s11 = scalar_lea.sflag [#allocation4], %s1106_s16  ;;  %s844_s23 = scalar_lea.vmem %s1162_s8, 256 }
 0x16e   : > { %p845_p4 = scmp.ne.s32.totalorder %s1162_s8, %s844_s23  ;;  %s929_s22 = smov [#allocation7]  }
 0x16f   : > { %s848_s17 = sshll.u32 %s929_s22, 4  ;;  %s849_s17 = int_to_ptr.vmem [resolvable:$false] %s848_s17 }
 0x170   : > { %p846_p0 = pnand %p845_p4, %p1236_p9  ;;  %s850_s14 = scalar_lea.vmem %s849_s17, 512 }
 0x171   : > { %p851_p11 = scmp.lt.s32.totalorder %s1162_s8, %s849_s17  ;;  %p852_p13 = scmp.lt.s32.totalorder %s850_s14, %s844_s23 }
 0x172   : > { %p847_p5 = pneg %p846_p0 }
 0x173   : > { %p853_p2 = por %p852_p13, %p851_p11 }
 0x175   : > { %p854_p6 = pnand %p853_p2, %p847_p5 }
 0x230   : > { %v675_v36 = vpop.f32.mrb[0].mxu1 }
 0x231   : > { %488 = vst [vmem:[%s260_s13 + $0x8] sm:$0x7] %v675_v36  ;;  %v478_v37 = vpop.f32.mrb[1].mxu1 }
 0x232   : > { %487 = vst [vmem:[%s260_s13] sm:$0xff] %v478_v37 }
 0x233   : > { %857 = shalt.err (!%p854_p6)
}
 0x234   : > { %s858_s7 = scalar_lea.hbm %s1167_s25, 256  ;;  %s862_s26 = scalar_lea.hbm %s1215_s4, 512 }
 0x235   : > { %p859_p12 = scmp.ne.s32.totalorder %s1167_s25, %s858_s7  ;;  %p863_p8 = scmp.lt.u32.totalorder %s1167_s25, %s1215_s4 }
 0x236   : > { %p864_p10 = scmp.lt.u32.totalorder %s862_s26, %s858_s7  ;;  %p866_p4 = scmp.lt.u32.totalorder %s858_s7, %s1167_s25 }
 0x237   : > { %p860_p3 = pnand %p859_p12, %p1236_p9 }
 0x238   : > { %p865_p1 = por %p864_p10, %p863_p8 }
 0x239   : > { %p861_p7 = pneg %p860_p3 }
 0x23a   : > { %p867_p0 = por %p866_p4, %p865_p1 }
 0x23c   : > { %p868_p5 = pnand %p867_p0, %p861_p7 }
 0x23e   : > { %871 = shalt.err (!%p868_p5)
}
 0x23f   : > { %s930_s29 = smov 128   ;;  %s931_s10 = smov 256  }
 0x240   : > { %s932_s28 = smov 8  }
 0x241   : > { %692 = dma.vmem_to_hbm [thread:$0]  (%p1236_p9), %s1162_s8, 256, %s1167_s25, %s490_s11, %s930_s29, %s931_s10, %s932_s28  }
 0x242 PF: > { %s534_s23 = sand.u32 1, %s906_s18   ;;  %p1237_p11 = scmp.ne.s32.totalorder %s1225_s6, 0 }
 0x243   : > { %p1238_p13 = scmp.ge.s32.totalorder %s918_s21, 2  ;;  %s535_s22 = scalar_lea.sflag [#allocation4], %s534_s23 }
 0x245   : > { %p705_p2 = pnand %p1238_p13, %p1237_p11 }
 0x247   : > { %897 = dma.done.wait (!%p705_p2), %s535_s22, 256  }
 0x248   : > { %899 = vsyncadd (!%p705_p2), %s535_s22, 4294967040  ;;  %s544_s17 = scalar_lea.sflag [#allocation9], %s534_s23 }
 0x249   : > { %901 = dma.done.wait (!%p705_p2), %s544_s17, 16  }
 0x24a   : > { %903 = vsyncadd (!%p705_p2), %s544_s17, 4294967280  ;;  %p23_p9 = scmp.ge.s32.totalorder %s988_s24, 4   ;;  %s1239_s18 = smov %s910_s19 }
 0x24b   : > { %s1240_s19 = smov %s914_s20  ;;  %s1241_s20 = smov %s1000_s27 }
 0x24c   : > { %s1242_s21 = smov %s988_s24  ;;  %25 = sbr.rel (!%p23_p9) target bundleno = 8 (0x8), region = 102 }
 0x253   :  { %548 = vsyncpa [#allocation3], 1 }
 0x254   :  { %550 = vsyncpa [#allocation3 + $0x1], 1 }
 0x255   :  { %551 = vsyncpa [#allocation6], 1 }
 0x256   :  { %552 = vsyncpa [#allocation4], 1 }
 0x257   :  { %554 = vsyncpa [#allocation4 + $0x1], 1 }
 0x258   :  { %555 = vsyncpa [#allocation9], 1 }
 0x259   :  { %557 = vsyncpa [#allocation9 + $0x1], 1 }

</bundles_post_ra>
